<compile_context>
chip_gen: v6e
topology: v6e:2x2x1
jax: 0.10.0
libtpu: 0.0.40
codegen_flags: <defaults>
</compile_context>

<pallas_src>
import jax
import jax.numpy as jnp
from jax import lax
from jax.experimental import pallas as pl
from jax.experimental.pallas import tpu as pltpu


def lstm_kernel(x_ref, wih_ref, whh_ref, y_ref, hn_ref, h_scr, c_scr, xw_scr):
    """One grid step = one time chunk.

    x_ref:   (T, B, I)  time-major input chunk
    wih_ref: (I, 4H)    fused input->gates weights (gate order i, f, g, o)
    whh_ref: (H, 4H)    fused hidden->gates weights
    y_ref:   (T, B, H)  hidden states for this chunk
    hn_ref:  (B, H)     final hidden state (constant-index block, written every chunk)
    h_scr/c_scr: (B, H) f32 carries, persist across grid steps
    xw_scr:  (T*B, 4H)  f32 scratch holding the chunk's input projection
    """
    chunk = pl.program_id(0)

    @pl.when(chunk == 0)
    def _():
        h_scr[...] = jnp.zeros_like(h_scr)
        c_scr[...] = jnp.zeros_like(c_scr)

    T, B, I = x_ref.shape
    H = h_scr.shape[-1]

    # ---- Phase 1 (parallel over the chunk): fused input projection ---------------
    # One MXU matmul with M = T*B, N = 4H; this is the half of the FLOPs that does
    # NOT need to sit on the serial critical path.
    x2 = x_ref[...].reshape(T * B, I)
    xw_scr[...] = jnp.dot(x2, wih_ref[...], preferred_element_type=jnp.float32)

    whh = whh_ref[...]  # (H, 4H), hoisted out of the loop

    # ---- Phase 2 (serial): recurrence, only h @ W_hh per step --------------------
    def step(t, carry):
        h, c = carry
        row = pl.multiple_of(t * B, B)  # sublane-aligned (B is a multiple of 8)
        gates = xw_scr[pl.ds(row, B), :] + jnp.dot(
            h, whh, preferred_element_type=jnp.float32)          # (B, 4H)
        i_g = jax.nn.sigmoid(gates[:, 0 * H:1 * H])
        f_g = jax.nn.sigmoid(gates[:, 1 * H:2 * H])
        g_g = jnp.tanh(gates[:, 2 * H:3 * H])
        o_g = jax.nn.sigmoid(gates[:, 3 * H:4 * H])
        c_new = f_g * c + i_g * g_g
        h_new = o_g * jnp.tanh(c_new)
        y_ref[t] = h_new.astype(y_ref.dtype)
        return h_new, c_new

    h, c = lax.fori_loop(0, T, step, (h_scr[...], c_scr[...]), unroll=True)

    h_scr[...] = h
    c_scr[...] = c
    # Unconditional cheap VMEM store; the last chunk's value is what lands in HBM.
    hn_ref[...] = h.astype(hn_ref.dtype)


def _pick_time_chunk(seq_len, max_chunk=16):
    """Largest divisor of seq_len that is <= max_chunk."""
    for t in range(min(seq_len, max_chunk), 0, -1):
        if seq_len % t == 0:
            return t
    return 1


def lstm_forward(x, w_ih, w_hh, *, t_chunk=None):
    """x: (B, S, I) f32. w_ih: (4H, I). w_hh: (4H, H) (PyTorch layout, bias=False).

    Returns (y, h_n) with y: (B, S, H), h_n: (1, B, H), matching the PyTorch module
    in eval mode (dropout == identity).
    """
    B, S, I = x.shape
    H = w_ih.shape[0] // 4

    if t_chunk is None:
        t_chunk = _pick_time_chunk(S)
    assert S % t_chunk == 0
    num_chunks = S // t_chunk

    # Pad batch to a full sublane group (8) so every vreg/MXU tile is dense.
    B_pad = pl.cdiv(B, 8) * 8

    # Time-major layout inside the kernel keeps the per-step projection slice
    # sublane-aligned. (Small one-pass transposes; activations are tiny vs weights.)
    x_t = jnp.transpose(x, (1, 0, 2))                 # (S, B, I)
    if B_pad != B:
        x_t = jnp.pad(x_t, ((0, 0), (0, B_pad - B), (0, 0)))

    # Fused gate weights for right-multiplication: columns ordered [i | f | g | o].
    wih4 = jnp.transpose(w_ih)                        # (I, 4H)
    whh4 = jnp.transpose(w_hh)                        # (H, 4H)

    y, hn = pl.pallas_call(
        lstm_kernel,
        grid=(num_chunks,),
        in_specs=[
            pl.BlockSpec((t_chunk, B_pad, I), lambda c: (c, 0, 0)),
            pl.BlockSpec((I, 4 * H), lambda c: (0, 0)),
            pl.BlockSpec((H, 4 * H), lambda c: (0, 0)),
        ],
        out_specs=[
            pl.BlockSpec((t_chunk, B_pad, H), lambda c: (c, 0, 0)),
            pl.BlockSpec((B_pad, H), lambda c: (0, 0)),
        ],
        out_shape=(
            jax.ShapeDtypeStruct((S, B_pad, H), x.dtype),
            jax.ShapeDtypeStruct((B_pad, H), x.dtype),
        ),
        scratch_shapes=[
            pltpu.VMEM((B_pad, H), jnp.float32),                  # h carry
            pltpu.VMEM((B_pad, H), jnp.float32),                  # c carry
            pltpu.VMEM((t_chunk * B_pad, 4 * H), jnp.float32),    # chunk X@W_ih
        ],
        compiler_params=pltpu.CompilerParams(
            dimension_semantics=("arbitrary",)),   # recurrence is inherently serial
    )(x_t, wih4, whh4)

    y = jnp.transpose(y[:, :B, :], (1, 0, 2))         # (B, S, H)
    h_n = hn[:B][None]                                # (1, B, H)
    # dropout == identity (eval mode)
    return y, h_n


def _lstm_reference(x, w_ih, w_hh):
    """Pure-JAX reference (lax.scan) for the correctness check."""
    B, S, I = x.shape
    H = w_ih.shape[0] // 4
    wih = jnp.transpose(w_ih.reshape(4, H, I), (0, 2, 1))
    whh = jnp.transpose(w_hh.reshape(4, H, H), (0, 2, 1))

    def step(carry, xt):
        h, c = carry
        g = lambda k: xt @ wih[k] + h @ whh[k]
        i_g = jax.nn.sigmoid(g(0))
        f_g = jax.nn.sigmoid(g(1))
        g_g = jnp.tanh(g(2))
        o_g = jax.nn.sigmoid(g(3))
        c = f_g * c + i_g * g_g
        h = o_g * jnp.tanh(c)
        return (h, c), h

    h0 = jnp.zeros((B, H), jnp.float32)
    (h_last, _), ys = lax.scan(step, (h0, h0), jnp.transpose(x, (1, 0, 2)))
    return jnp.transpose(ys, (1, 0, 2)), h_last[None]


if __name__ == "__main__":
    B, S, I, H = 2, 8, 16, 32  # batch, seq, input_size, hidden_size

    key = jax.random.PRNGKey(0)
    kx, kih, khh = jax.random.split(key, 3)

    # Deterministic PyTorch-style init: U(-1/sqrt(H), 1/sqrt(H)); bias=False.
    bound = 1.0 / jnp.sqrt(jnp.float32(H))
    x = jax.random.normal(kx, (B, S, I), dtype=jnp.float32)
    w_ih = jax.random.uniform(kih, (4 * H, I), jnp.float32, -bound, bound)
    w_hh = jax.random.uniform(khh, (4 * H, H), jnp.float32, -bound, bound)

    y, h_n = lstm_forward(x, w_ih, w_hh)
    y = jax.block_until_ready(y)
    h_n = jax.block_until_ready(h_n)

    y_ref, h_ref = _lstm_reference(x, w_ih, w_hh)
    assert y.shape == (B, S, H) and h_n.shape == (1, B, H)
    assert jnp.allclose(y, y_ref, atol=1e-5, rtol=1e-5)
    assert jnp.allclose(h_n, h_ref, atol=1e-5, rtol=1e-5)

    print("KERNEL_OK")
</pallas_src>

<mosaic_0001>
module attributes {stable_mosaic.version = 11 : i64} {
  func.func @lstm_kernel(%arg0: i32, %arg1: memref<8x8x16xf32, #tpu.memory_space<vmem>>, %arg2: memref<16x128xf32, #tpu.memory_space<vmem>>, %arg3: memref<32x128xf32, #tpu.memory_space<vmem>>, %arg4: memref<8x8x32xf32, #tpu.memory_space<vmem>>, %arg5: memref<8x32xf32, #tpu.memory_space<vmem>>, %arg6: memref<8x32xf32, #tpu.memory_space<vmem>>, %arg7: memref<8x32xf32, #tpu.memory_space<vmem>>, %arg8: memref<64x128xf32, #tpu.memory_space<vmem>>) attributes {dimension_semantics = [#tpu.dimension_semantics<arbitrary>], iteration_bounds = array<i64: 1>, scalar_prefetch = 0 : i64, scratch_operands = 3 : i64, tpu.core_type = #tpu.core_type<tc>, window_params = [{transform_indices = @transform_0, window_bounds = array<i64: 8, 8, 16>}, {pipeline_mode = #tpu.pipeline_mode<synchronous>, transform_indices = @transform_1, window_bounds = array<i64: 16, 128>}, {pipeline_mode = #tpu.pipeline_mode<synchronous>, transform_indices = @transform_2, window_bounds = array<i64: 32, 128>}, {transform_indices = @transform_3, window_bounds = array<i64: 8, 8, 32>}, {pipeline_mode = #tpu.pipeline_mode<synchronous>, transform_indices = @transform_4, window_bounds = array<i64: 8, 32>}]} {
    %c0_i32 = arith.constant 0 : i32
    %0 = arith.cmpi eq, %arg0, %c0_i32 : i32
    %1 = arith.extui %0 : i1 to i32
    %c0_i32_0 = arith.constant 0 : i32
    %2 = arith.cmpi ne, %1, %c0_i32_0 : i32
    scf.if %2 {
      %cst_84 = arith.constant 0.000000e+00 : f32
      %294 = vector.broadcast %cst_84 : f32 to vector<8x32xf32>
      %c0_85 = arith.constant 0 : index
      %c0_86 = arith.constant 0 : index
      %295 = vector.load %arg6[%c0_85, %c0_86] : memref<8x32xf32, #tpu.memory_space<vmem>>, vector<8x32xf32>
      tpu.vector_store %arg6[%c0_85, %c0_86], %294 {strides = array<i32>} : memref<8x32xf32, #tpu.memory_space<vmem>>, vector<8x32xf32>,
      %cst_87 = arith.constant 0.000000e+00 : f32
      %296 = vector.broadcast %cst_87 : f32 to vector<8x32xf32>
      %c0_88 = arith.constant 0 : index
      %c0_89 = arith.constant 0 : index
      %297 = vector.load %arg7[%c0_88, %c0_89] : memref<8x32xf32, #tpu.memory_space<vmem>>, vector<8x32xf32>
      tpu.vector_store %arg7[%c0_88, %c0_89], %296 {strides = array<i32>} : memref<8x32xf32, #tpu.memory_space<vmem>>, vector<8x32xf32>,
    } else {
    }
    %c0 = arith.constant 0 : index
    %c0_1 = arith.constant 0 : index
    %c0_2 = arith.constant 0 : index
    %3 = vector.load %arg1[%c0, %c0_1, %c0_2] : memref<8x8x16xf32, #tpu.memory_space<vmem>>, vector<8x8x16xf32>
    %4 = vector.shape_cast %3 : vector<8x8x16xf32> to vector<64x16xf32>
    %c0_3 = arith.constant 0 : index
    %c0_4 = arith.constant 0 : index
    %5 = vector.load %arg2[%c0_3, %c0_4] : memref<16x128xf32, #tpu.memory_space<vmem>>, vector<16x128xf32>
    %cst = arith.constant dense<0.000000e+00> : vector<64x128xf32>
    %6 = tpu.matmul %4, %5, %cst {dimension_numbers = #tpu.dot_dimension_numbers<[1], [0], [0], [1], [0, 0, 1, 1], [], []>} : vector<64x16xf32>, vector<16x128xf32>, vector<64x128xf32> -> vector<64x128xf32>
    %c0_5 = arith.constant 0 : index
    %c0_6 = arith.constant 0 : index
    %7 = vector.load %arg8[%c0_5, %c0_6] : memref<64x128xf32, #tpu.memory_space<vmem>>, vector<64x128xf32>
    tpu.vector_store %arg8[%c0_5, %c0_6], %6 {strides = array<i32>} : memref<64x128xf32, #tpu.memory_space<vmem>>, vector<64x128xf32>,
    %c0_7 = arith.constant 0 : index
    %c0_8 = arith.constant 0 : index
    %8 = vector.load %arg3[%c0_7, %c0_8] : memref<32x128xf32, #tpu.memory_space<vmem>>, vector<32x128xf32>
    %c0_9 = arith.constant 0 : index
    %c0_10 = arith.constant 0 : index
    %9 = vector.load %arg6[%c0_9, %c0_10] : memref<8x32xf32, #tpu.memory_space<vmem>>, vector<8x32xf32>
    %c0_11 = arith.constant 0 : index
    %c0_12 = arith.constant 0 : index
    %10 = vector.load %arg7[%c0_11, %c0_12] : memref<8x32xf32, #tpu.memory_space<vmem>>, vector<8x32xf32>
    %c0_i32_13 = arith.constant 0 : i32
    %c8_i32 = arith.constant 8 : i32
    %11 = arith.muli %c0_i32_13, %c8_i32 : i32
    %12 = tpu.assume_multiple %11, 8 : i32
    %13 = arith.index_cast %12 : i32 to index
    %c0_14 = arith.constant 0 : index
    %14 = vector.load %arg8[%13, %c0_14] : memref<64x128xf32, #tpu.memory_space<vmem>>, vector<8x128xf32>
    %cst_15 = arith.constant dense<0.000000e+00> : vector<8x128xf32>
    %15 = tpu.matmul %9, %8, %cst_15 {dimension_numbers = #tpu.dot_dimension_numbers<[1], [0], [0], [1], [0, 0, 1, 1], [], []>} : vector<8x32xf32>, vector<32x128xf32>, vector<8x128xf32> -> vector<8x128xf32>
    %16 = arith.addf %14, %15 : vector<8x128xf32>
    %17 = vector.extract_strided_slice %16 {offsets = [0, 0], sizes = [8, 32], strides = [1, 1]} : vector<8x128xf32> to vector<8x32xf32>
    %18 = arith.negf %17 : vector<8x32xf32>
    %19 = math.exp %18 : vector<8x32xf32>
    %cst_16 = arith.constant 1.000000e+00 : f32
    %20 = vector.broadcast %cst_16 : f32 to vector<8x32xf32>
    %21 = arith.addf %20, %19 : vector<8x32xf32>
    %22 = arith.divf %20, %21 : vector<8x32xf32>
    %23 = vector.extract_strided_slice %16 {offsets = [0, 32], sizes = [8, 32], strides = [1, 1]} : vector<8x128xf32> to vector<8x32xf32>
    %24 = arith.negf %23 : vector<8x32xf32>
    %25 = math.exp %24 : vector<8x32xf32>
    %cst_17 = arith.constant 1.000000e+00 : f32
    %26 = vector.broadcast %cst_17 : f32 to vector<8x32xf32>
    %27 = arith.addf %26, %25 : vector<8x32xf32>
    %28 = arith.divf %26, %27 : vector<8x32xf32>
    %29 = vector.extract_strided_slice %16 {offsets = [0, 64], sizes = [8, 32], strides = [1, 1]} : vector<8x128xf32> to vector<8x32xf32>
    %30 = math.tanh %29 : vector<8x32xf32>
    %31 = vector.extract_strided_slice %16 {offsets = [0, 96], sizes = [8, 32], strides = [1, 1]} : vector<8x128xf32> to vector<8x32xf32>
    %32 = arith.negf %31 : vector<8x32xf32>
    %33 = math.exp %32 : vector<8x32xf32>
    %cst_18 = arith.constant 1.000000e+00 : f32
    %34 = vector.broadcast %cst_18 : f32 to vector<8x32xf32>
    %35 = arith.addf %34, %33 : vector<8x32xf32>
    %36 = arith.divf %34, %35 : vector<8x32xf32>
    %37 = arith.mulf %28, %10 : vector<8x32xf32>
    %38 = arith.mulf %22, %30 : vector<8x32xf32>
    %39 = arith.addf %37, %38 : vector<8x32xf32>
    %40 = math.tanh %39 : vector<8x32xf32>
    %41 = arith.mulf %36, %40 : vector<8x32xf32>
    %42 = arith.index_cast %c0_i32_13 : i32 to index
    %c0_19 = arith.constant 0 : index
    %c0_20 = arith.constant 0 : index
    %43 = vector.load %arg4[%42, %c0_19, %c0_20] : memref<8x8x32xf32, #tpu.memory_space<vmem>>, vector<1x8x32xf32>
    %44 = vector.shape_cast %43 : vector<1x8x32xf32> to vector<8x32xf32>
    %45 = vector.shape_cast %41 : vector<8x32xf32> to vector<1x8x32xf32>
    tpu.vector_store %arg4[%42, %c0_19, %c0_20], %45 {strides = array<i32>} : memref<8x8x32xf32, #tpu.memory_space<vmem>>, vector<1x8x32xf32>,
    %c1_i32 = arith.constant 1 : i32
    %c8_i32_21 = arith.constant 8 : i32
    %46 = arith.muli %c1_i32, %c8_i32_21 : i32
    %47 = tpu.assume_multiple %46, 8 : i32
    %48 = arith.index_cast %47 : i32 to index
    %c0_22 = arith.constant 0 : index
    %49 = vector.load %arg8[%48, %c0_22] : memref<64x128xf32, #tpu.memory_space<vmem>>, vector<8x128xf32>
    %cst_23 = arith.constant dense<0.000000e+00> : vector<8x128xf32>
    %50 = tpu.matmul %41, %8, %cst_23 {dimension_numbers = #tpu.dot_dimension_numbers<[1], [0], [0], [1], [0, 0, 1, 1], [], []>} : vector<8x32xf32>, vector<32x128xf32>, vector<8x128xf32> -> vector<8x128xf32>
    %51 = arith.addf %49, %50 : vector<8x128xf32>
    %52 = vector.extract_strided_slice %51 {offsets = [0, 0], sizes = [8, 32], strides = [1, 1]} : vector<8x128xf32> to vector<8x32xf32>
    %53 = arith.negf %52 : vector<8x32xf32>
    %54 = math.exp %53 : vector<8x32xf32>
    %cst_24 = arith.constant 1.000000e+00 : f32
    %55 = vector.broadcast %cst_24 : f32 to vector<8x32xf32>
    %56 = arith.addf %55, %54 : vector<8x32xf32>
    %57 = arith.divf %55, %56 : vector<8x32xf32>
    %58 = vector.extract_strided_slice %51 {offsets = [0, 32], sizes = [8, 32], strides = [1, 1]} : vector<8x128xf32> to vector<8x32xf32>
    %59 = arith.negf %58 : vector<8x32xf32>
    %60 = math.exp %59 : vector<8x32xf32>
    %cst_25 = arith.constant 1.000000e+00 : f32
    %61 = vector.broadcast %cst_25 : f32 to vector<8x32xf32>
    %62 = arith.addf %61, %60 : vector<8x32xf32>
    %63 = arith.divf %61, %62 : vector<8x32xf32>
    %64 = vector.extract_strided_slice %51 {offsets = [0, 64], sizes = [8, 32], strides = [1, 1]} : vector<8x128xf32> to vector<8x32xf32>
    %65 = math.tanh %64 : vector<8x32xf32>
    %66 = vector.extract_strided_slice %51 {offsets = [0, 96], sizes = [8, 32], strides = [1, 1]} : vector<8x128xf32> to vector<8x32xf32>
    %67 = arith.negf %66 : vector<8x32xf32>
    %68 = math.exp %67 : vector<8x32xf32>
    %cst_26 = arith.constant 1.000000e+00 : f32
    %69 = vector.broadcast %cst_26 : f32 to vector<8x32xf32>
    %70 = arith.addf %69, %68 : vector<8x32xf32>
    %71 = arith.divf %69, %70 : vector<8x32xf32>
    %72 = arith.mulf %63, %39 : vector<8x32xf32>
    %73 = arith.mulf %57, %65 : vector<8x32xf32>
    %74 = arith.addf %72, %73 : vector<8x32xf32>
    %75 = math.tanh %74 : vector<8x32xf32>
    %76 = arith.mulf %71, %75 : vector<8x32xf32>
    %77 = arith.index_cast %c1_i32 : i32 to index
    %c0_27 = arith.constant 0 : index
    %c0_28 = arith.constant 0 : index
    %78 = vector.load %arg4[%77, %c0_27, %c0_28] : memref<8x8x32xf32, #tpu.memory_space<vmem>>, vector<1x8x32xf32>
    %79 = vector.shape_cast %78 : vector<1x8x32xf32> to vector<8x32xf32>
    %80 = vector.shape_cast %76 : vector<8x32xf32> to vector<1x8x32xf32>
    tpu.vector_store %arg4[%77, %c0_27, %c0_28], %80 {strides = array<i32>} : memref<8x8x32xf32, #tpu.memory_space<vmem>>, vector<1x8x32xf32>,
    %c2_i32 = arith.constant 2 : i32
    %c8_i32_29 = arith.constant 8 : i32
    %81 = arith.muli %c2_i32, %c8_i32_29 : i32
    %82 = tpu.assume_multiple %81, 8 : i32
    %83 = arith.index_cast %82 : i32 to index
    %c0_30 = arith.constant 0 : index
    %84 = vector.load %arg8[%83, %c0_30] : memref<64x128xf32, #tpu.memory_space<vmem>>, vector<8x128xf32>
    %cst_31 = arith.constant dense<0.000000e+00> : vector<8x128xf32>
    %85 = tpu.matmul %76, %8, %cst_31 {dimension_numbers = #tpu.dot_dimension_numbers<[1], [0], [0], [1], [0, 0, 1, 1], [], []>} : vector<8x32xf32>, vector<32x128xf32>, vector<8x128xf32> -> vector<8x128xf32>
    %86 = arith.addf %84, %85 : vector<8x128xf32>
    %87 = vector.extract_strided_slice %86 {offsets = [0, 0], sizes = [8, 32], strides = [1, 1]} : vector<8x128xf32> to vector<8x32xf32>
    %88 = arith.negf %87 : vector<8x32xf32>
    %89 = math.exp %88 : vector<8x32xf32>
    %cst_32 = arith.constant 1.000000e+00 : f32
    %90 = vector.broadcast %cst_32 : f32 to vector<8x32xf32>
    %91 = arith.addf %90, %89 : vector<8x32xf32>
    %92 = arith.divf %90, %91 : vector<8x32xf32>
    %93 = vector.extract_strided_slice %86 {offsets = [0, 32], sizes = [8, 32], strides = [1, 1]} : vector<8x128xf32> to vector<8x32xf32>
    %94 = arith.negf %93 : vector<8x32xf32>
    %95 = math.exp %94 : vector<8x32xf32>
    %cst_33 = arith.constant 1.000000e+00 : f32
    %96 = vector.broadcast %cst_33 : f32 to vector<8x32xf32>
    %97 = arith.addf %96, %95 : vector<8x32xf32>
    %98 = arith.divf %96, %97 : vector<8x32xf32>
    %99 = vector.extract_strided_slice %86 {offsets = [0, 64], sizes = [8, 32], strides = [1, 1]} : vector<8x128xf32> to vector<8x32xf32>
    %100 = math.tanh %99 : vector<8x32xf32>
    %101 = vector.extract_strided_slice %86 {offsets = [0, 96], sizes = [8, 32], strides = [1, 1]} : vector<8x128xf32> to vector<8x32xf32>
    %102 = arith.negf %101 : vector<8x32xf32>
    %103 = math.exp %102 : vector<8x32xf32>
    %cst_34 = arith.constant 1.000000e+00 : f32
    %104 = vector.broadcast %cst_34 : f32 to vector<8x32xf32>
    %105 = arith.addf %104, %103 : vector<8x32xf32>
    %106 = arith.divf %104, %105 : vector<8x32xf32>
    %107 = arith.mulf %98, %74 : vector<8x32xf32>
    %108 = arith.mulf %92, %100 : vector<8x32xf32>
    %109 = arith.addf %107, %108 : vector<8x32xf32>
    %110 = math.tanh %109 : vector<8x32xf32>
    %111 = arith.mulf %106, %110 : vector<8x32xf32>
    %112 = arith.index_cast %c2_i32 : i32 to index
    %c0_35 = arith.constant 0 : index
    %c0_36 = arith.constant 0 : index
    %113 = vector.load %arg4[%112, %c0_35, %c0_36] : memref<8x8x32xf32, #tpu.memory_space<vmem>>, vector<1x8x32xf32>
    %114 = vector.shape_cast %113 : vector<1x8x32xf32> to vector<8x32xf32>
    %115 = vector.shape_cast %111 : vector<8x32xf32> to vector<1x8x32xf32>
    tpu.vector_store %arg4[%112, %c0_35, %c0_36], %115 {strides = array<i32>} : memref<8x8x32xf32, #tpu.memory_space<vmem>>, vector<1x8x32xf32>,
    %c3_i32 = arith.constant 3 : i32
    %c8_i32_37 = arith.constant 8 : i32
    %116 = arith.muli %c3_i32, %c8_i32_37 : i32
    %117 = tpu.assume_multiple %116, 8 : i32
    %118 = arith.index_cast %117 : i32 to index
    %c0_38 = arith.constant 0 : index
    %119 = vector.load %arg8[%118, %c0_38] : memref<64x128xf32, #tpu.memory_space<vmem>>, vector<8x128xf32>
    %cst_39 = arith.constant dense<0.000000e+00> : vector<8x128xf32>
    %120 = tpu.matmul %111, %8, %cst_39 {dimension_numbers = #tpu.dot_dimension_numbers<[1], [0], [0], [1], [0, 0, 1, 1], [], []>} : vector<8x32xf32>, vector<32x128xf32>, vector<8x128xf32> -> vector<8x128xf32>
    %121 = arith.addf %119, %120 : vector<8x128xf32>
    %122 = vector.extract_strided_slice %121 {offsets = [0, 0], sizes = [8, 32], strides = [1, 1]} : vector<8x128xf32> to vector<8x32xf32>
    %123 = arith.negf %122 : vector<8x32xf32>
    %124 = math.exp %123 : vector<8x32xf32>
    %cst_40 = arith.constant 1.000000e+00 : f32
    %125 = vector.broadcast %cst_40 : f32 to vector<8x32xf32>
    %126 = arith.addf %125, %124 : vector<8x32xf32>
    %127 = arith.divf %125, %126 : vector<8x32xf32>
    %128 = vector.extract_strided_slice %121 {offsets = [0, 32], sizes = [8, 32], strides = [1, 1]} : vector<8x128xf32> to vector<8x32xf32>
    %129 = arith.negf %128 : vector<8x32xf32>
    %130 = math.exp %129 : vector<8x32xf32>
    %cst_41 = arith.constant 1.000000e+00 : f32
    %131 = vector.broadcast %cst_41 : f32 to vector<8x32xf32>
    %132 = arith.addf %131, %130 : vector<8x32xf32>
    %133 = arith.divf %131, %132 : vector<8x32xf32>
    %134 = vector.extract_strided_slice %121 {offsets = [0, 64], sizes = [8, 32], strides = [1, 1]} : vector<8x128xf32> to vector<8x32xf32>
    %135 = math.tanh %134 : vector<8x32xf32>
    %136 = vector.extract_strided_slice %121 {offsets = [0, 96], sizes = [8, 32], strides = [1, 1]} : vector<8x128xf32> to vector<8x32xf32>
    %137 = arith.negf %136 : vector<8x32xf32>
    %138 = math.exp %137 : vector<8x32xf32>
    %cst_42 = arith.constant 1.000000e+00 : f32
    %139 = vector.broadcast %cst_42 : f32 to vector<8x32xf32>
    %140 = arith.addf %139, %138 : vector<8x32xf32>
    %141 = arith.divf %139, %140 : vector<8x32xf32>
    %142 = arith.mulf %133, %109 : vector<8x32xf32>
    %143 = arith.mulf %127, %135 : vector<8x32xf32>
    %144 = arith.addf %142, %143 : vector<8x32xf32>
    %145 = math.tanh %144 : vector<8x32xf32>
    %146 = arith.mulf %141, %145 : vector<8x32xf32>
    %147 = arith.index_cast %c3_i32 : i32 to index
    %c0_43 = arith.constant 0 : index
    %c0_44 = arith.constant 0 : index
    %148 = vector.load %arg4[%147, %c0_43, %c0_44] : memref<8x8x32xf32, #tpu.memory_space<vmem>>, vector<1x8x32xf32>
    %149 = vector.shape_cast %148 : vector<1x8x32xf32> to vector<8x32xf32>
    %150 = vector.shape_cast %146 : vector<8x32xf32> to vector<1x8x32xf32>
    tpu.vector_store %arg4[%147, %c0_43, %c0_44], %150 {strides = array<i32>} : memref<8x8x32xf32, #tpu.memory_space<vmem>>, vector<1x8x32xf32>,
    %c4_i32 = arith.constant 4 : i32
    %c8_i32_45 = arith.constant 8 : i32
    %151 = arith.muli %c4_i32, %c8_i32_45 : i32
    %152 = tpu.assume_multiple %151, 8 : i32
    %153 = arith.index_cast %152 : i32 to index
    %c0_46 = arith.constant 0 : index
    %154 = vector.load %arg8[%153, %c0_46] : memref<64x128xf32, #tpu.memory_space<vmem>>, vector<8x128xf32>
    %cst_47 = arith.constant dense<0.000000e+00> : vector<8x128xf32>
    %155 = tpu.matmul %146, %8, %cst_47 {dimension_numbers = #tpu.dot_dimension_numbers<[1], [0], [0], [1], [0, 0, 1, 1], [], []>} : vector<8x32xf32>, vector<32x128xf32>, vector<8x128xf32> -> vector<8x128xf32>
    %156 = arith.addf %154, %155 : vector<8x128xf32>
    %157 = vector.extract_strided_slice %156 {offsets = [0, 0], sizes = [8, 32], strides = [1, 1]} : vector<8x128xf32> to vector<8x32xf32>
    %158 = arith.negf %157 : vector<8x32xf32>
    %159 = math.exp %158 : vector<8x32xf32>
    %cst_48 = arith.constant 1.000000e+00 : f32
    %160 = vector.broadcast %cst_48 : f32 to vector<8x32xf32>
    %161 = arith.addf %160, %159 : vector<8x32xf32>
    %162 = arith.divf %160, %161 : vector<8x32xf32>
    %163 = vector.extract_strided_slice %156 {offsets = [0, 32], sizes = [8, 32], strides = [1, 1]} : vector<8x128xf32> to vector<8x32xf32>
    %164 = arith.negf %163 : vector<8x32xf32>
    %165 = math.exp %164 : vector<8x32xf32>
    %cst_49 = arith.constant 1.000000e+00 : f32
    %166 = vector.broadcast %cst_49 : f32 to vector<8x32xf32>
    %167 = arith.addf %166, %165 : vector<8x32xf32>
    %168 = arith.divf %166, %167 : vector<8x32xf32>
    %169 = vector.extract_strided_slice %156 {offsets = [0, 64], sizes = [8, 32], strides = [1, 1]} : vector<8x128xf32> to vector<8x32xf32>
    %170 = math.tanh %169 : vector<8x32xf32>
    %171 = vector.extract_strided_slice %156 {offsets = [0, 96], sizes = [8, 32], strides = [1, 1]} : vector<8x128xf32> to vector<8x32xf32>
    %172 = arith.negf %171 : vector<8x32xf32>
    %173 = math.exp %172 : vector<8x32xf32>
    %cst_50 = arith.constant 1.000000e+00 : f32
    %174 = vector.broadcast %cst_50 : f32 to vector<8x32xf32>
    %175 = arith.addf %174, %173 : vector<8x32xf32>
    %176 = arith.divf %174, %175 : vector<8x32xf32>
    %177 = arith.mulf %168, %144 : vector<8x32xf32>
    %178 = arith.mulf %162, %170 : vector<8x32xf32>
    %179 = arith.addf %177, %178 : vector<8x32xf32>
    %180 = math.tanh %179 : vector<8x32xf32>
    %181 = arith.mulf %176, %180 : vector<8x32xf32>
    %182 = arith.index_cast %c4_i32 : i32 to index
    %c0_51 = arith.constant 0 : index
    %c0_52 = arith.constant 0 : index
    %183 = vector.load %arg4[%182, %c0_51, %c0_52] : memref<8x8x32xf32, #tpu.memory_space<vmem>>, vector<1x8x32xf32>
    %184 = vector.shape_cast %183 : vector<1x8x32xf32> to vector<8x32xf32>
    %185 = vector.shape_cast %181 : vector<8x32xf32> to vector<1x8x32xf32>
    tpu.vector_store %arg4[%182, %c0_51, %c0_52], %185 {strides = array<i32>} : memref<8x8x32xf32, #tpu.memory_space<vmem>>, vector<1x8x32xf32>,
    %c5_i32 = arith.constant 5 : i32
    %c8_i32_53 = arith.constant 8 : i32
    %186 = arith.muli %c5_i32, %c8_i32_53 : i32
    %187 = tpu.assume_multiple %186, 8 : i32
    %188 = arith.index_cast %187 : i32 to index
    %c0_54 = arith.constant 0 : index
    %189 = vector.load %arg8[%188, %c0_54] : memref<64x128xf32, #tpu.memory_space<vmem>>, vector<8x128xf32>
    %cst_55 = arith.constant dense<0.000000e+00> : vector<8x128xf32>
    %190 = tpu.matmul %181, %8, %cst_55 {dimension_numbers = #tpu.dot_dimension_numbers<[1], [0], [0], [1], [0, 0, 1, 1], [], []>} : vector<8x32xf32>, vector<32x128xf32>, vector<8x128xf32> -> vector<8x128xf32>
    %191 = arith.addf %189, %190 : vector<8x128xf32>
    %192 = vector.extract_strided_slice %191 {offsets = [0, 0], sizes = [8, 32], strides = [1, 1]} : vector<8x128xf32> to vector<8x32xf32>
    %193 = arith.negf %192 : vector<8x32xf32>
    %194 = math.exp %193 : vector<8x32xf32>
    %cst_56 = arith.constant 1.000000e+00 : f32
    %195 = vector.broadcast %cst_56 : f32 to vector<8x32xf32>
    %196 = arith.addf %195, %194 : vector<8x32xf32>
    %197 = arith.divf %195, %196 : vector<8x32xf32>
    %198 = vector.extract_strided_slice %191 {offsets = [0, 32], sizes = [8, 32], strides = [1, 1]} : vector<8x128xf32> to vector<8x32xf32>
    %199 = arith.negf %198 : vector<8x32xf32>
    %200 = math.exp %199 : vector<8x32xf32>
    %cst_57 = arith.constant 1.000000e+00 : f32
    %201 = vector.broadcast %cst_57 : f32 to vector<8x32xf32>
    %202 = arith.addf %201, %200 : vector<8x32xf32>
    %203 = arith.divf %201, %202 : vector<8x32xf32>
    %204 = vector.extract_strided_slice %191 {offsets = [0, 64], sizes = [8, 32], strides = [1, 1]} : vector<8x128xf32> to vector<8x32xf32>
    %205 = math.tanh %204 : vector<8x32xf32>
    %206 = vector.extract_strided_slice %191 {offsets = [0, 96], sizes = [8, 32], strides = [1, 1]} : vector<8x128xf32> to vector<8x32xf32>
    %207 = arith.negf %206 : vector<8x32xf32>
    %208 = math.exp %207 : vector<8x32xf32>
    %cst_58 = arith.constant 1.000000e+00 : f32
    %209 = vector.broadcast %cst_58 : f32 to vector<8x32xf32>
    %210 = arith.addf %209, %208 : vector<8x32xf32>
    %211 = arith.divf %209, %210 : vector<8x32xf32>
    %212 = arith.mulf %203, %179 : vector<8x32xf32>
    %213 = arith.mulf %197, %205 : vector<8x32xf32>
    %214 = arith.addf %212, %213 : vector<8x32xf32>
    %215 = math.tanh %214 : vector<8x32xf32>
    %216 = arith.mulf %211, %215 : vector<8x32xf32>
    %217 = arith.index_cast %c5_i32 : i32 to index
    %c0_59 = arith.constant 0 : index
    %c0_60 = arith.constant 0 : index
    %218 = vector.load %arg4[%217, %c0_59, %c0_60] : memref<8x8x32xf32, #tpu.memory_space<vmem>>, vector<1x8x32xf32>
    %219 = vector.shape_cast %218 : vector<1x8x32xf32> to vector<8x32xf32>
    %220 = vector.shape_cast %216 : vector<8x32xf32> to vector<1x8x32xf32>
    tpu.vector_store %arg4[%217, %c0_59, %c0_60], %220 {strides = array<i32>} : memref<8x8x32xf32, #tpu.memory_space<vmem>>, vector<1x8x32xf32>,
    %c6_i32 = arith.constant 6 : i32
    %c8_i32_61 = arith.constant 8 : i32
    %221 = arith.muli %c6_i32, %c8_i32_61 : i32
    %222 = tpu.assume_multiple %221, 8 : i32
    %223 = arith.index_cast %222 : i32 to index
    %c0_62 = arith.constant 0 : index
    %224 = vector.load %arg8[%223, %c0_62] : memref<64x128xf32, #tpu.memory_space<vmem>>, vector<8x128xf32>
    %cst_63 = arith.constant dense<0.000000e+00> : vector<8x128xf32>
    %225 = tpu.matmul %216, %8, %cst_63 {dimension_numbers = #tpu.dot_dimension_numbers<[1], [0], [0], [1], [0, 0, 1, 1], [], []>} : vector<8x32xf32>, vector<32x128xf32>, vector<8x128xf32> -> vector<8x128xf32>
    %226 = arith.addf %224, %225 : vector<8x128xf32>
    %227 = vector.extract_strided_slice %226 {offsets = [0, 0], sizes = [8, 32], strides = [1, 1]} : vector<8x128xf32> to vector<8x32xf32>
    %228 = arith.negf %227 : vector<8x32xf32>
    %229 = math.exp %228 : vector<8x32xf32>
    %cst_64 = arith.constant 1.000000e+00 : f32
    %230 = vector.broadcast %cst_64 : f32 to vector<8x32xf32>
    %231 = arith.addf %230, %229 : vector<8x32xf32>
    %232 = arith.divf %230, %231 : vector<8x32xf32>
    %233 = vector.extract_strided_slice %226 {offsets = [0, 32], sizes = [8, 32], strides = [1, 1]} : vector<8x128xf32> to vector<8x32xf32>
    %234 = arith.negf %233 : vector<8x32xf32>
    %235 = math.exp %234 : vector<8x32xf32>
    %cst_65 = arith.constant 1.000000e+00 : f32
    %236 = vector.broadcast %cst_65 : f32 to vector<8x32xf32>
    %237 = arith.addf %236, %235 : vector<8x32xf32>
    %238 = arith.divf %236, %237 : vector<8x32xf32>
    %239 = vector.extract_strided_slice %226 {offsets = [0, 64], sizes = [8, 32], strides = [1, 1]} : vector<8x128xf32> to vector<8x32xf32>
    %240 = math.tanh %239 : vector<8x32xf32>
    %241 = vector.extract_strided_slice %226 {offsets = [0, 96], sizes = [8, 32], strides = [1, 1]} : vector<8x128xf32> to vector<8x32xf32>
    %242 = arith.negf %241 : vector<8x32xf32>
    %243 = math.exp %242 : vector<8x32xf32>
    %cst_66 = arith.constant 1.000000e+00 : f32
    %244 = vector.broadcast %cst_66 : f32 to vector<8x32xf32>
    %245 = arith.addf %244, %243 : vector<8x32xf32>
    %246 = arith.divf %244, %245 : vector<8x32xf32>
    %247 = arith.mulf %238, %214 : vector<8x32xf32>
    %248 = arith.mulf %232, %240 : vector<8x32xf32>
    %249 = arith.addf %247, %248 : vector<8x32xf32>
    %250 = math.tanh %249 : vector<8x32xf32>
    %251 = arith.mulf %246, %250 : vector<8x32xf32>
    %252 = arith.index_cast %c6_i32 : i32 to index
    %c0_67 = arith.constant 0 : index
    %c0_68 = arith.constant 0 : index
    %253 = vector.load %arg4[%252, %c0_67, %c0_68] : memref<8x8x32xf32, #tpu.memory_space<vmem>>, vector<1x8x32xf32>
    %254 = vector.shape_cast %253 : vector<1x8x32xf32> to vector<8x32xf32>
    %255 = vector.shape_cast %251 : vector<8x32xf32> to vector<1x8x32xf32>
    tpu.vector_store %arg4[%252, %c0_67, %c0_68], %255 {strides = array<i32>} : memref<8x8x32xf32, #tpu.memory_space<vmem>>, vector<1x8x32xf32>,
    %c7_i32 = arith.constant 7 : i32
    %c8_i32_69 = arith.constant 8 : i32
    %256 = arith.muli %c7_i32, %c8_i32_69 : i32
    %257 = tpu.assume_multiple %256, 8 : i32
    %258 = arith.index_cast %257 : i32 to index
    %c0_70 = arith.constant 0 : index
    %259 = vector.load %arg8[%258, %c0_70] : memref<64x128xf32, #tpu.memory_space<vmem>>, vector<8x128xf32>
    %cst_71 = arith.constant dense<0.000000e+00> : vector<8x128xf32>
    %260 = tpu.matmul %251, %8, %cst_71 {dimension_numbers = #tpu.dot_dimension_numbers<[1], [0], [0], [1], [0, 0, 1, 1], [], []>} : vector<8x32xf32>, vector<32x128xf32>, vector<8x128xf32> -> vector<8x128xf32>
    %261 = arith.addf %259, %260 : vector<8x128xf32>
    %262 = vector.extract_strided_slice %261 {offsets = [0, 0], sizes = [8, 32], strides = [1, 1]} : vector<8x128xf32> to vector<8x32xf32>
    %263 = arith.negf %262 : vector<8x32xf32>
    %264 = math.exp %263 : vector<8x32xf32>
    %cst_72 = arith.constant 1.000000e+00 : f32
    %265 = vector.broadcast %cst_72 : f32 to vector<8x32xf32>
    %266 = arith.addf %265, %264 : vector<8x32xf32>
    %267 = arith.divf %265, %266 : vector<8x32xf32>
    %268 = vector.extract_strided_slice %261 {offsets = [0, 32], sizes = [8, 32], strides = [1, 1]} : vector<8x128xf32> to vector<8x32xf32>
    %269 = arith.negf %268 : vector<8x32xf32>
    %270 = math.exp %269 : vector<8x32xf32>
    %cst_73 = arith.constant 1.000000e+00 : f32
    %271 = vector.broadcast %cst_73 : f32 to vector<8x32xf32>
    %272 = arith.addf %271, %270 : vector<8x32xf32>
    %273 = arith.divf %271, %272 : vector<8x32xf32>
    %274 = vector.extract_strided_slice %261 {offsets = [0, 64], sizes = [8, 32], strides = [1, 1]} : vector<8x128xf32> to vector<8x32xf32>
    %275 = math.tanh %274 : vector<8x32xf32>
    %276 = vector.extract_strided_slice %261 {offsets = [0, 96], sizes = [8, 32], strides = [1, 1]} : vector<8x128xf32> to vector<8x32xf32>
    %277 = arith.negf %276 : vector<8x32xf32>
    %278 = math.exp %277 : vector<8x32xf32>
    %cst_74 = arith.constant 1.000000e+00 : f32
    %279 = vector.broadcast %cst_74 : f32 to vector<8x32xf32>
    %280 = arith.addf %279, %278 : vector<8x32xf32>
    %281 = arith.divf %279, %280 : vector<8x32xf32>
    %282 = arith.mulf %273, %249 : vector<8x32xf32>
    %283 = arith.mulf %267, %275 : vector<8x32xf32>
    %284 = arith.addf %282, %283 : vector<8x32xf32>
    %285 = math.tanh %284 : vector<8x32xf32>
    %286 = arith.mulf %281, %285 : vector<8x32xf32>
    %287 = arith.index_cast %c7_i32 : i32 to index
    %c0_75 = arith.constant 0 : index
    %c0_76 = arith.constant 0 : index
    %288 = vector.load %arg4[%287, %c0_75, %c0_76] : memref<8x8x32xf32, #tpu.memory_space<vmem>>, vector<1x8x32xf32>
    %289 = vector.shape_cast %288 : vector<1x8x32xf32> to vector<8x32xf32>
    %290 = vector.shape_cast %286 : vector<8x32xf32> to vector<1x8x32xf32>
    tpu.vector_store %arg4[%287, %c0_75, %c0_76], %290 {strides = array<i32>} : memref<8x8x32xf32, #tpu.memory_space<vmem>>, vector<1x8x32xf32>,
    %c8_i32_77 = arith.constant 8 : i32
    %c0_78 = arith.constant 0 : index
    %c0_79 = arith.constant 0 : index
    %291 = vector.load %arg6[%c0_78, %c0_79] : memref<8x32xf32, #tpu.memory_space<vmem>>, vector<8x32xf32>
    tpu.vector_store %arg6[%c0_78, %c0_79], %286 {strides = array<i32>} : memref<8x32xf32, #tpu.memory_space<vmem>>, vector<8x32xf32>,
    %c0_80 = arith.constant 0 : index
    %c0_81 = arith.constant 0 : index
    %292 = vector.load %arg7[%c0_80, %c0_81] : memref<8x32xf32, #tpu.memory_space<vmem>>, vector<8x32xf32>
    tpu.vector_store %arg7[%c0_80, %c0_81], %284 {strides = array<i32>} : memref<8x32xf32, #tpu.memory_space<vmem>>, vector<8x32xf32>,
    %c0_82 = arith.constant 0 : index
    %c0_83 = arith.constant 0 : index
    %293 = vector.load %arg5[%c0_82, %c0_83] : memref<8x32xf32, #tpu.memory_space<vmem>>, vector<8x32xf32>
    tpu.vector_store %arg5[%c0_82, %c0_83], %286 {strides = array<i32>} : memref<8x32xf32, #tpu.memory_space<vmem>>, vector<8x32xf32>,
    return
  }
  func.func @transform_0(%arg0: i32) -> (i32, i32, i32) {
    %c0_i32 = arith.constant 0 : i32
    %c0_i32_0 = arith.constant 0 : i32
    %c0_i32_1 = arith.constant 0 : i32
    return %arg0, %c0_i32, %c0_i32_0 : i32, i32, i32
  }
  func.func @transform_1(%arg0: i32) -> (i32, i32) {
    %c0_i32 = arith.constant 0 : i32
    %c0_i32_0 = arith.constant 0 : i32
    %c0_i32_1 = arith.constant 0 : i32
    return %c0_i32, %c0_i32_0 : i32, i32
  }
  func.func @transform_2(%arg0: i32) -> (i32, i32) {
    %c0_i32 = arith.constant 0 : i32
    %c0_i32_0 = arith.constant 0 : i32
    %c0_i32_1 = arith.constant 0 : i32
    return %c0_i32, %c0_i32_0 : i32, i32
  }
  func.func @transform_3(%arg0: i32) -> (i32, i32, i32) {
    %c0_i32 = arith.constant 0 : i32
    %c0_i32_0 = arith.constant 0 : i32
    %c0_i32_1 = arith.constant 0 : i32
    return %arg0, %c0_i32, %c0_i32_0 : i32, i32, i32
  }
  func.func @transform_4(%arg0: i32) -> (i32, i32) {
    %c0_i32 = arith.constant 0 : i32
    %c0_i32_0 = arith.constant 0 : i32
    %c0_i32_1 = arith.constant 0 : i32
    return %c0_i32, %c0_i32_0 : i32, i32
  }
}

</mosaic_0001>

<bundles_post_ra>
// kernel: tpu_custom_call.1
= control target key start
LH: loop header
LB: loop body
LE: loop exit
PB: predicated region body
PF: predicated region fallthrough
CT: control target
= control target key end

     0   :  { %10 = vsyncpa [#allocation6], 0  ;;  %s1693_s0 = inlined_call_operand.hbm [shape: f32[8,8,16], index: 0, kind: input, shape index: {}]   ;;  %s1694_s1 = inlined_call_operand.hbm [shape: f32[16,128], index: 1, kind: input, shape index: {}]   ;;  %s1695_s2 = inlined_call_operand.hbm [shape: f32[32,128], index: 2, kind: input, shape index: {}]   ;;  %s1696_s3 = inlined_call_operand.hbm [shape: f32[8,8,32], index: 3, kind: output, shape index: {0}]   ;;  %s1697_s4 = inlined_call_operand.hbm [shape: f32[8,32], index: 4, kind: output, shape index: {1}]  }
   0x1   :  { %11 = vsyncpa [#allocation9], 0 }
   0x2   :  { %12 = vsyncpa [#allocation7], 0 }
   0x3   :  { %13 = vsyncpa [#allocation13], 0  ;;  %s1465_s15 = smov [#allocation8]   ;;  %s1466_s17 = smov [#allocation5]  }
   0x4   :  { %s31_s16 = sshll.u32 %s1465_s15, 4  ;;  %s19_s18 = sshll.u32 %s1466_s17, 4  ;;  %s32_s16 = int_to_ptr.vmem [resolvable:$true] %s31_s16  ;;  %s20_s18 = int_to_ptr.vmem [resolvable:$true] %s19_s18 }
   0x5   :  { %s1365_s19 = scalar_lea.vmem %s32_s16, 256  ;;  %p1370_p1 = scmp.lt.s32.totalorder %s32_s16, %s32_s16 }
   0x6   :  { %p1366_p0 = scmp.ne.s32.totalorder %s32_s16, %s1365_s19  ;;  %p1371_p2 = scmp.lt.s32.totalorder %s1365_s19, %s1365_s19 }
   0x8   :  { %p1372_p3 = por %p1371_p2, %p1370_p1 }
   0xa   :  { %p1373_p4 = pnand %p1372_p3, %p1366_p0 }
   0xc   :  { %1376 = shalt.err (!%p1373_p4)
}
   0xd   :  { %s1467_s20 = smov 128   ;;  %s1468_s21 = smov 8  }
   0xe   :  { %37 = dma.hbm_to_vmem [thread:$0]  %s1694_s1, 256, %s32_s16, [#allocation9], %s1467_s20, %s1467_s20, %s1468_s21  }
   0xf   :  { %s1385_s24 = scalar_lea.vmem %s20_s18, 1024  ;;  %p1390_p6 = scmp.lt.s32.totalorder %s20_s18, %s20_s18 }
  0x10   :  { %p1386_p5 = scmp.ne.s32.totalorder %s20_s18, %s1385_s24  ;;  %p1391_p7 = scmp.lt.s32.totalorder %s1385_s24, %s1385_s24 }
  0x12   :  { %p1392_p8 = por %p1391_p7, %p1390_p6 }
  0x14   :  { %p1393_p9 = pnand %p1392_p8, %p1386_p5 }
  0x16   :  { %1396 = shalt.err (!%p1393_p9)
}
  0x17   :  { %25 = dma.hbm_to_vmem [thread:$0]  %s1693_s0, 1024, %s20_s18, [#allocation6], %s1467_s20, %s1467_s20, %s1468_s21  }
  0x18   :  { %s1469_s27 = smov [#allocation10]  }
  0x19   :  { %s43_s28 = sshll.u32 %s1469_s27, 4  ;;  %s44_s28 = int_to_ptr.vmem [resolvable:$true] %s43_s28 }
  0x1a   :  { %s1405_s29 = scalar_lea.vmem %s44_s28, 512  ;;  %p1410_p11 = scmp.lt.s32.totalorder %s44_s28, %s44_s28 }
  0x1b   :  { %p1406_p10 = scmp.ne.s32.totalorder %s44_s28, %s1405_s29  ;;  %p1411_p12 = scmp.lt.s32.totalorder %s1405_s29, %s1405_s29 }
  0x1d   :  { %p1412_p13 = por %p1411_p12, %p1410_p11 }
  0x1f   :  { %p1413_p0 = pnand %p1412_p13, %p1406_p10 }
  0x21   :  { %1416 = shalt.err (!%p1413_p0)
}
  0x22   :  { %49 = dma.hbm_to_vmem [thread:$0]  %s1695_s2, 512, %s44_s28, [#allocation9], %s1467_s20, %s1467_s20, %s1468_s21  }
  0x23   :  { %1457 = dma.done.wait [#allocation6], 1024  }
  0x24   :  { %1458 = vsyncadd [#allocation6], 4294966272 }
  0x25   :  { %1459 = dma.done.wait [#allocation9], 768  }
  0x26   :  { %1460 = vsyncadd [#allocation9], 4294966528  ;;  %vm63_vm0 = vcmask 261120   ;;  %v1470_v0 = vmov 0.0   ;;  %vm1471_vm1 = vmmov 0   ;;  %v75_v1 = vld [vmem:[#allocation8 + $0x8] sm:$0xff] }
  0x27   :  { %1193 = vmatprep.subr.mxu1 %v1470_v0  ;;  %1201 = vmatprep.mubr.msk.f32.mxu1 %vm1471_vm1, %v1470_v0  ;;  %64 = vst.msk [vmem:[#allocation2] sm:$0xff] %vm63_vm0, %v1470_v0  ;;  %65 = vst.msk [vmem:[#allocation3] sm:$0xff] %vm63_vm0, %v1470_v0  ;;  %v1527_v2 = vld [vmem:[#allocation10 + $0x18] sm:$0xff]  ;;  %v74_v3 = vld [vmem:[#allocation8] sm:$0xff]  ;;  %vm76_vm2 = vcmask 130048   ;;  %s1472_s0 = smov 64  }
  0x28   :  { %1177 = vmatprep.subr.mxu0 %v75_v1  ;;  %1194 = vmatpush3.msra.mxu1 %v1527_v2  ;;  %v1530_v4 = vld [vmem:[#allocation10 + $0x10] sm:$0xff]  ;;  %v67_v6 = vld [vmem:[#allocation5 + $0x8] sm:$0xff]  ;;  %v1534_v7 = vld [vmem:[#allocation10 + $0x8] sm:$0xff]  ;;  %s1473_s2 = smov 32   ;;  %s1474_s5 = smov 96  }
  0x29   :  { %v66_v5 = vld [vmem:[#allocation5] sm:$0xff]  ;;  %1178 = vmatpush3.msra.mxu0 %v75_v1  ;;  %1195 = vmatprep.subr.mxu1 %v1470_v0  ;;  %v1539_v8 = vld [vmem:[#allocation10] sm:$0xff]  ;;  %v69_v45 = vld [vmem:[#allocation5 + $0x18] sm:$0xff]  ;;  %s1475_s6 = smov [#allocation11]   ;;  %s1476_s8 = smov [#allocation12]  }
  0x2a   :  { %1179 = vmatprep.subr.mxu0 %v74_v3  ;;  %1196 = vmatpush3.msra.mxu1 %v1530_v4  ;;  %v68_v44 = vld [vmem:[#allocation5 + $0x10] sm:$0xff]  ;;  %v70_v46 = vld [vmem:[#allocation5 + $0x20] sm:$0xff]  ;;  %v71_v47 = vld [vmem:[#allocation5 + $0x28] sm:$0xff]  ;;  %s1076_s7 = sshll.u32 %s1475_s6, 4  ;;  %s1089_s9 = sshll.u32 %s1476_s8, 4  ;;  %s1077_s7 = int_to_ptr.vmem [resolvable:$true] %s1076_s7  ;;  %s1090_s9 = int_to_ptr.vmem [resolvable:$true] %s1089_s9 }
  0x2b   :  { %1180 = vmatpush3.msra.mxu0 %v74_v3  ;;  %1181 = vmatprep.mubr.msk.f32.mxu0 %vm76_vm2, %v66_v5  ;;  %v72_v48 = vld [vmem:[#allocation5 + $0x30] sm:$0xff]  ;;  %v73_v49 = vld [vmem:[#allocation5 + $0x38] sm:$0xff]  ;;  %s1417_s10 = scalar_lea.vmem %s1077_s7, 1024  ;;  %p1422_p2 = scmp.lt.s32.totalorder %s1077_s7, %s1077_s7 }
  0x2c   :  { %1197 = vmatprep.subr.mxu1 %v1470_v0  ;;  %1182 = vmatmul.mubr.msk.f32.vlgmr.msra.gmra.mxu0 %vm76_vm2, %v67_v6  ;;  %p1418_p1 = scmp.ne.s32.totalorder %s1077_s7, %s1417_s10  ;;  %p1423_p3 = scmp.lt.s32.totalorder %s1417_s10, %s1417_s10 }
  0x2d   :  { %1198 = vmatpush3.msra.mxu1 %v1534_v7  ;;  %1215 = vmatprep.subr.mxu0 %v1470_v0 }
  0x2e   :  { %v218_v9 = vld [vmem:[#allocation2] sm:$0xff]  ;;  %1199 = vmatprep.subr.mxu1 %v1470_v0  ;;  %1216 = vmatpush3.msra.mxu0 %v1527_v2  ;;  %v219_v16 = vld [vmem:[#allocation3] sm:$0xff]  ;;  %p1424_p4 = por %p1423_p3, %p1422_p2 }
  0x2f   :  { %1200 = vmatpush3.msra.mxu1 %v1539_v8  ;;  %1217 = vmatprep.subr.mxu0 %v1470_v0 }
  0x30   :  { %1202 = vmatmul.mubr.msk.f32.vlgmr.msra.gmra.mxu1 %vm63_vm0, %v218_v9  ;;  %1204 = vmatprep.subr.mxu1 %v1470_v0  ;;  %p1425_p5 = pnand %p1424_p4, %p1418_p1 }
  0x31   :  { %1205 = vmatpush3.msra.mxu1 %v1527_v2  ;;  %1212 = vmatprep.mubr.msk.f32.mxu1 %vm1471_vm1, %v1470_v0 }
  0x32   :  { %1206 = vmatprep.subr.mxu1 %v1470_v0  ;;  %1218 = vmatpush3.msra.mxu0 %v1530_v4 }
  0x33   :  { %1207 = vmatpush3.msra.mxu1 %v1530_v4  ;;  %1219 = vmatprep.subr.mxu0 %v1470_v0 }
  0x34   :  { %1208 = vmatprep.subr.mxu1 %v1470_v0  ;;  %1220 = vmatpush3.msra.mxu0 %v1534_v7 }
  0x35   :  { %1209 = vmatpush3.msra.mxu1 %v1534_v7  ;;  %1221 = vmatprep.subr.mxu0 %v1470_v0 }
  0x36   :  { %1210 = vmatprep.subr.mxu1 %v1470_v0  ;;  %1222 = vmatpush3.msra.mxu0 %v1539_v8 }
  0x37   :  { %1211 = vmatpush3.msra.mxu1 %v1539_v8  ;;  %1237 = vmatprep.subr.mxu0 %v1470_v0 }
  0x38   :  { %1226 = vmatprep.subr.mxu1 %v1470_v0  ;;  %1184 = vmatprep.mubr.msk.f32.mxu0 %vm76_vm2, %v68_v44 }
  0x39   :  { %1185 = vmatmul.mubr.msk.f32.gmra.mxu0 %vm76_vm2, %v69_v45 }
  0x3a   :  { %1187 = vmatprep.mubr.msk.f32.mxu0 %vm76_vm2, %v70_v46 }
  0x3d   :  { %1188 = vmatmul.mubr.msk.f32.gmra.mxu0 %vm76_vm2, %v71_v47 }
  0x3e   :  { %1190 = vmatprep.mubr.msk.f32.mxu0 %vm76_vm2, %v72_v48 }
  0x41   :  { %1191 = vmatmul.mubr.msk.f32.gmra.mxu0 %vm76_vm2, %v73_v49 }
  0x42   :  { %1223 = vmatprep.mubr.msk.f32.mxu0 %vm1471_vm1, %v1470_v0 }
  0xec   :  { %v1183_v10 = vpop.f32.mrf.mxu0 }
  0xee   :  { %v167_v11 = vpop.f32.mrf.mxu0 }
  0xf0   :  { %v291_v12 = vpop.f32.mrf.mxu1 }
  0xf1   :  { %v295_v13 = vadd.f32 %v291_v12, %v167_v11 }
  0xf2   :  { %v1203_v14 = vpop.f32.mrf.mxu1 }
  0xf3   :  { %1293 = vtanh.f32 %v295_v13  ;;  %v1112_v17 = vmul.f32 -1.442695, %v295_v13 }
  0xf5   :  { %1295 = vpow2.f32 %v1112_v17 }
  0xf9   :  { %v1186_v54 = vpop.f32.mrf.mxu0 }
  0xfb   :  { %v177_v55 = vpop.f32.mrf.mxu0 }
  0xfd   :  { %v1606_v56 = vpop.f32.mrf.mxu0 }
  0xff   :  { %v1608_v57 = vpop.f32.mrf.mxu0 }
 0x100   :  { %v1294_v15 = vpop.eup %1293 }
 0x101   :  { %309 = vrot.lane.b32.xlu0 %v1294_v15, %s1472_s0  ;;  %v1610_v58 = vpop.f32.mrf.mxu0 }
 0x102   :  { %v1296_v18 = vpop.eup %1295 }
 0x103   :  { %v299_v19 = vadd.f32 1.0, %v1296_v18  ;;  %v1612_v59 = vpop.f32.mrf.mxu0 }
 0x105   :  { %304 = vrot.lane.b32.xlu0 %v219_v16, %s1473_s2  ;;  %1297 = vrcp.f32 %v299_v19 }
 0x112   :  { %v1298_v20 = vpop.eup %1297 }
 0x173   :  { %v310_v21 = vpop.permute.xlu0 %309 }
 0x174   :  { %v312_v22 = vmul.f32 %v1298_v20, %v310_v21 }
 0x176   :  { %314 = vrot.lane.b32.xlu1 %v312_v22, %s1473_s2 }
 0x177   :  { %v305_v23 = vpop.permute.xlu0 %304 }
 0x178   :  { %v307_v24 = vmul.f32 %v1298_v20, %v305_v23 }
 0x1e8   :  { %v315_v25 = vpop.permute.xlu1 %314 }
 0x1e9   :  { %v317_v26 = vadd.f32 %v315_v25, %v307_v24 }
 0x1eb   :  { %1299 = vtanh.f32 %v317_v26 }
 0x1f8   :  { %v1300_v27 = vpop.eup %1299 }
 0x1f9   :  { %320 = vrot.lane.b32.xlu1 %v1300_v27, %s1472_s0 }
 0x26b   :  { %v321_v28 = vpop.permute.xlu1 %320 }
 0x26c   :  { %v323_v29 = vmul.f32 %v1298_v20, %v321_v28 }
 0x26e   :  { %325 = vrot.lane.b32.xlu0 %v323_v29, %s1473_s2 }
 0x2e0   :  { %v326_v30 = vpop.permute.xlu0 %325 }
 0x2e1   :  { %328 = vst.msk [vmem:[#allocation11] sm:$0xff] %vm63_vm0, %v326_v30  ;;  %1213 = vmatmul.mubr.msk.f32.vlgmr.msra.gmra.mxu1 %vm63_vm0, %v326_v30 }
 0x2e2   :  { %1227 = vmatpush3.msra.mxu1 %v1527_v2  ;;  %1234 = vmatprep.mubr.msk.f32.mxu1 %vm1471_vm1, %v1470_v0 }
 0x2e3   :  { %1228 = vmatprep.subr.mxu1 %v1470_v0 }
 0x2e4   :  { %1229 = vmatpush3.msra.mxu1 %v1530_v4 }
 0x2e5   :  { %1230 = vmatprep.subr.mxu1 %v1470_v0 }
 0x2e6   :  { %1231 = vmatpush3.msra.mxu1 %v1534_v7 }
 0x2e7   :  { %1232 = vmatprep.subr.mxu1 %v1470_v0 }
 0x2e8   :  { %1233 = vmatpush3.msra.mxu1 %v1539_v8 }
 0x2e9   :  { %1248 = vmatprep.subr.mxu1 %v1470_v0 }
 0x3a1   :  { %v399_v31 = vpop.f32.mrf.mxu1 }
 0x3a2   :  { %v403_v32 = vadd.f32 %v1183_v10, %v399_v31 }
 0x3a3   :  { %v1214_v33 = vpop.f32.mrf.mxu1 }
 0x3a4   :  { %1301 = vtanh.f32 %v403_v32  ;;  %v1114_v35 = vmul.f32 -1.442695, %v403_v32 }
 0x3a6   :  { %1303 = vpow2.f32 %v1114_v35 }
 0x3b1   :  { %v1302_v34 = vpop.eup %1301 }
 0x3b2   :  { %413 = vrot.lane.b32.xlu1 %v1302_v34, %s1472_s0 }
 0x3b3   :  { %v1304_v36 = vpop.eup %1303 }
 0x3b4   :  { %v407_v37 = vadd.f32 1.0, %v1304_v36 }
 0x3b6   :  { %1305 = vrcp.f32 %v407_v37 }
 0x3c3   :  { %v1306_v38 = vpop.eup %1305 }
 0x3c4   :  { %v411_v41 = vmul.f32 %v1306_v38, %v317_v26 }
 0x424   :  { %v414_v39 = vpop.permute.xlu1 %413 }
 0x425   :  { %v416_v40 = vmul.f32 %v1306_v38, %v414_v39 }
 0x427   :  { %418 = vrot.lane.b32.xlu0 %v416_v40, %s1473_s2 }
 0x499   :  { %v419_v42 = vpop.permute.xlu0 %418 }
 0x49a   :  { %v421_v43 = vadd.f32 %v419_v42, %v411_v41 }
 0x49c   :  { %1307 = vtanh.f32 %v421_v43 }
 0x4a9   :  { %v1308_v50 = vpop.eup %1307 }
 0x4aa   :  { %424 = vrot.lane.b32.xlu1 %v1308_v50, %s1472_s0 }
 0x51c   :  { %v425_v51 = vpop.permute.xlu1 %424 }
 0x51d   :  { %v427_v52 = vmul.f32 %v1306_v38, %v425_v51 }
 0x51f   :  { %429 = vrot.lane.b32.xlu0 %v427_v52, %s1473_s2 }
 0x591   :  { %v430_v53 = vpop.permute.xlu0 %429 }
 0x592   :  { %433 = vst.msk [vmem:[#allocation11 + $0x8] sm:$0xff] %vm63_vm0, %v430_v53  ;;  %1224 = vmatmul.mubr.msk.f32.vlgmr.msra.gmra.mxu0 %vm63_vm0, %v430_v53 }
 0x593   :  { %1238 = vmatpush3.msra.mxu0 %v1527_v2  ;;  %1245 = vmatprep.mubr.msk.f32.mxu0 %vm1471_vm1, %v1470_v0 }
 0x594   :  { %1239 = vmatprep.subr.mxu0 %v1470_v0 }
 0x595   :  { %1240 = vmatpush3.msra.mxu0 %v1530_v4 }
 0x596   :  { %1241 = vmatprep.subr.mxu0 %v1470_v0 }
 0x597   :  { %1242 = vmatpush3.msra.mxu0 %v1534_v7 }
 0x598   :  { %1243 = vmatprep.subr.mxu0 %v1470_v0 }
 0x599   :  { %1244 = vmatpush3.msra.mxu0 %v1539_v8 }
 0x59a   :  { %1259 = vmatprep.subr.mxu0 %v1470_v0 }
 0x652   :  { %v504_v60 = vpop.f32.mrf.mxu0 }
 0x653   :  { %v508_v61 = vadd.f32 %v504_v60, %v177_v55 }
 0x654   :  { %v1225_v62 = vpop.f32.mrf.mxu0 }
 0x655   :  { %1309 = vtanh.f32 %v508_v61  ;;  %v1116_v1 = vmul.f32 -1.442695, %v508_v61 }
 0x657   :  { %1311 = vpow2.f32 %v1116_v1 }
 0x662   :  { %v1310_v63 = vpop.eup %1309 }
 0x663   :  { %518 = vrot.lane.b32.xlu1 %v1310_v63, %s1472_s0 }
 0x664   :  { %v1312_v3 = vpop.eup %1311 }
 0x665   :  { %v512_v5 = vadd.f32 1.0, %v1312_v3 }
 0x667   :  { %1313 = vrcp.f32 %v512_v5 }
 0x674   :  { %v1314_v6 = vpop.eup %1313 }
 0x675   :  { %v516_v11 = vmul.f32 %v1314_v6, %v421_v43 }
 0x6d5   :  { %v519_v9 = vpop.permute.xlu1 %518 }
 0x6d6   :  { %v521_v10 = vmul.f32 %v1314_v6, %v519_v9 }
 0x6d8   :  { %523 = vrot.lane.b32.xlu0 %v521_v10, %s1473_s2 }
 0x74a   :  { %v524_v12 = vpop.permute.xlu0 %523 }
 0x74b   :  { %v526_v13 = vadd.f32 %v524_v12, %v516_v11 }
 0x74d   :  { %1315 = vtanh.f32 %v526_v13 }
 0x75a   :  { %v1316_v14 = vpop.eup %1315 }
 0x75b   :  { %529 = vrot.lane.b32.xlu1 %v1316_v14, %s1472_s0 }
 0x7cd   :  { %v530_v15 = vpop.permute.xlu1 %529 }
 0x7ce   :  { %v532_v16 = vmul.f32 %v1314_v6, %v530_v15 }
 0x7d0   :  { %534 = vrot.lane.b32.xlu0 %v532_v16, %s1473_s2 }
 0x842   :  { %v535_v17 = vpop.permute.xlu0 %534 }
 0x843   :  { %538 = vst.msk [vmem:[#allocation11 + $0x10] sm:$0xff] %vm63_vm0, %v535_v17  ;;  %1235 = vmatmul.mubr.msk.f32.vlgmr.msra.gmra.mxu1 %vm63_vm0, %v535_v17 }
 0x844   :  { %1249 = vmatpush3.msra.mxu1 %v1527_v2  ;;  %1256 = vmatprep.mubr.msk.f32.mxu1 %vm1471_vm1, %v1470_v0 }
 0x845   :  { %1250 = vmatprep.subr.mxu1 %v1470_v0 }
 0x846   :  { %1251 = vmatpush3.msra.mxu1 %v1530_v4 }
 0x847   :  { %1252 = vmatprep.subr.mxu1 %v1470_v0 }
 0x848   :  { %1253 = vmatpush3.msra.mxu1 %v1534_v7 }
 0x849   :  { %1254 = vmatprep.subr.mxu1 %v1470_v0 }
 0x84a   :  { %1255 = vmatpush3.msra.mxu1 %v1539_v8 }
 0x84b   :  { %1270 = vmatprep.subr.mxu1 %v1470_v0 }
 0x903   :  { %v609_v18 = vpop.f32.mrf.mxu1 }
 0x904   :  { %v613_v19 = vadd.f32 %v1186_v54, %v609_v18 }
 0x905   :  { %v1236_v20 = vpop.f32.mrf.mxu1 }
 0x906   :  { %1317 = vtanh.f32 %v613_v19  ;;  %v1118_v22 = vmul.f32 -1.442695, %v613_v19 }
 0x908   :  { %1319 = vpow2.f32 %v1118_v22 }
 0x913   :  { %v1318_v21 = vpop.eup %1317 }
 0x914   :  { %623 = vrot.lane.b32.xlu1 %v1318_v21, %s1472_s0 }
 0x915   :  { %v1320_v23 = vpop.eup %1319 }
 0x916   :  { %v617_v24 = vadd.f32 1.0, %v1320_v23 }
 0x918   :  { %1321 = vrcp.f32 %v617_v24 }
 0x925   :  { %v1322_v25 = vpop.eup %1321 }
 0x926   :  { %v621_v28 = vmul.f32 %v1322_v25, %v526_v13 }
 0x986   :  { %v624_v26 = vpop.permute.xlu1 %623 }
 0x987   :  { %v626_v27 = vmul.f32 %v1322_v25, %v624_v26 }
 0x989   :  { %628 = vrot.lane.b32.xlu0 %v626_v27, %s1473_s2 }
 0x9fb   :  { %v629_v29 = vpop.permute.xlu0 %628 }
 0x9fc   :  { %v631_v30 = vadd.f32 %v629_v29, %v621_v28 }
 0x9fe   :  { %1323 = vtanh.f32 %v631_v30 }
 0xa0b   :  { %v1324_v31 = vpop.eup %1323 }
 0xa0c   :  { %634 = vrot.lane.b32.xlu1 %v1324_v31, %s1472_s0 }
 0xa7e   :  { %v635_v32 = vpop.permute.xlu1 %634 }
 0xa7f   :  { %v637_v33 = vmul.f32 %v1322_v25, %v635_v32 }
 0xa81   :  { %639 = vrot.lane.b32.xlu0 %v637_v33, %s1473_s2 }
 0xaf3   :  { %v640_v34 = vpop.permute.xlu0 %639 }
 0xaf4   :  { %643 = vst.msk [vmem:[#allocation11 + $0x18] sm:$0xff] %vm63_vm0, %v640_v34  ;;  %1246 = vmatmul.mubr.msk.f32.vlgmr.msra.gmra.mxu0 %vm63_vm0, %v640_v34 }
 0xaf5   :  { %1260 = vmatpush3.msra.mxu0 %v1527_v2  ;;  %1267 = vmatprep.mubr.msk.f32.mxu0 %vm1471_vm1, %v1470_v0 }
 0xaf6   :  { %1261 = vmatprep.subr.mxu0 %v1470_v0 }
 0xaf7   :  { %1262 = vmatpush3.msra.mxu0 %v1530_v4 }
 0xaf8   :  { %1263 = vmatprep.subr.mxu0 %v1470_v0 }
 0xaf9   :  { %1264 = vmatpush3.msra.mxu0 %v1534_v7 }
 0xafa   :  { %1265 = vmatprep.subr.mxu0 %v1470_v0 }
 0xafb   :  { %1266 = vmatpush3.msra.mxu0 %v1539_v8 }
 0xbb4   :  { %v714_v35 = vpop.f32.mrf.mxu0 }
 0xbb5   :  { %v718_v36 = vadd.f32 %v714_v35, %v1608_v57 }
 0xbb6   :  { %v1247_v37 = vpop.f32.mrf.mxu0 }
 0xbb7   :  { %1325 = vtanh.f32 %v718_v36  ;;  %v1120_v39 = vmul.f32 -1.442695, %v718_v36 }
 0xbb9   :  { %1327 = vpow2.f32 %v1120_v39 }
 0xbc4   :  { %v1326_v38 = vpop.eup %1325 }
 0xbc5   :  { %728 = vrot.lane.b32.xlu1 %v1326_v38, %s1472_s0 }
 0xbc6   :  { %v1328_v40 = vpop.eup %1327 }
 0xbc7   :  { %v722_v41 = vadd.f32 1.0, %v1328_v40 }
 0xbc9   :  { %1329 = vrcp.f32 %v722_v41 }
 0xbd6   :  { %v1330_v42 = vpop.eup %1329 }
 0xbd7   :  { %v726_v45 = vmul.f32 %v1330_v42, %v631_v30 }
 0xc37   :  { %v729_v43 = vpop.permute.xlu1 %728 }
 0xc38   :  { %v731_v44 = vmul.f32 %v1330_v42, %v729_v43 }
 0xc3a   :  { %733 = vrot.lane.b32.xlu0 %v731_v44, %s1473_s2 }
 0xcac   :  { %v734_v46 = vpop.permute.xlu0 %733 }
 0xcad   :  { %v736_v47 = vadd.f32 %v734_v46, %v726_v45 }
 0xcaf   :  { %1331 = vtanh.f32 %v736_v47 }
 0xcbc   :  { %v1332_v48 = vpop.eup %1331 }
 0xcbd   :  { %739 = vrot.lane.b32.xlu1 %v1332_v48, %s1472_s0 }
 0xd2f   :  { %v740_v49 = vpop.permute.xlu1 %739 }
 0xd30   :  { %v742_v50 = vmul.f32 %v1330_v42, %v740_v49 }
 0xd32   :  { %744 = vrot.lane.b32.xlu0 %v742_v50, %s1473_s2 }
 0xda4   :  { %v745_v51 = vpop.permute.xlu0 %744 }
 0xda5   :  { %748 = vst.msk [vmem:[#allocation11 + $0x20] sm:$0xff] %vm63_vm0, %v745_v51  ;;  %1257 = vmatmul.mubr.msk.f32.vlgmr.msra.gmra.mxu1 %vm63_vm0, %v745_v51 }
 0xda6   :  { %1271 = vmatpush3.msra.mxu1 %v1527_v2  ;;  %1278 = vmatprep.mubr.msk.f32.mxu1 %vm1471_vm1, %v1470_v0 }
 0xda7   :  { %1272 = vmatprep.subr.mxu1 %v1470_v0 }
 0xda8   :  { %1273 = vmatpush3.msra.mxu1 %v1530_v4 }
 0xda9   :  { %1274 = vmatprep.subr.mxu1 %v1470_v0 }
 0xdaa   :  { %1275 = vmatpush3.msra.mxu1 %v1534_v7 }
 0xdab   :  { %1276 = vmatprep.subr.mxu1 %v1470_v0 }
 0xdac   :  { %1277 = vmatpush3.msra.mxu1 %v1539_v8 }
 0xe65   :  { %v819_v52 = vpop.f32.mrf.mxu1 }
 0xe66   :  { %v823_v53 = vadd.f32 %v1606_v56, %v819_v52 }
 0xe67   :  { %v1258_v54 = vpop.f32.mrf.mxu1 }
 0xe68   :  { %1333 = vtanh.f32 %v823_v53  ;;  %v1122_v55 = vmul.f32 -1.442695, %v823_v53 }
 0xe6a   :  { %1335 = vpow2.f32 %v1122_v55 }
 0xe75   :  { %v1334_v2 = vpop.eup %1333 }
 0xe76   :  { %833 = vrot.lane.b32.xlu1 %v1334_v2, %s1472_s0 }
 0xe77   :  { %v1336_v57 = vpop.eup %1335 }
 0xe78   :  { %v827_v4 = vadd.f32 1.0, %v1336_v57 }
 0xe7a   :  { %1337 = vrcp.f32 %v827_v4 }
 0xe87   :  { %v1338_v60 = vpop.eup %1337 }
 0xe88   :  { %v831_v0 = vmul.f32 %v1338_v60, %v736_v47 }
 0xee8   :  { %v834_v61 = vpop.permute.xlu1 %833 }
 0xee9   :  { %v836_v7 = vmul.f32 %v1338_v60, %v834_v61 }
 0xeeb   :  { %838 = vrot.lane.b32.xlu0 %v836_v7, %s1473_s2 }
 0xf5d   :  { %v839_v8 = vpop.permute.xlu0 %838 }
 0xf5e   :  { %v841_v62 = vadd.f32 %v839_v8, %v831_v0 }
 0xf60   :  { %1339 = vtanh.f32 %v841_v62 }
 0xf6d   :  { %v1340_v56 = vpop.eup %1339 }
 0xf6e   :  { %844 = vrot.lane.b32.xlu1 %v1340_v56, %s1472_s0 }
 0xfe0   :  { %v845_v63 = vpop.permute.xlu1 %844 }
 0xfe1   :  { %v847_v1 = vmul.f32 %v1338_v60, %v845_v63 }
 0xfe3   :  { %849 = vrot.lane.b32.xlu0 %v847_v1, %s1473_s2 }
0x1055   :  { %v850_v3 = vpop.permute.xlu0 %849 }
0x1056   :  { %853 = vst.msk [vmem:[#allocation11 + $0x28] sm:$0xff] %vm63_vm0, %v850_v3  ;;  %1268 = vmatmul.mubr.msk.f32.vlgmr.msra.gmra.mxu0 %vm63_vm0, %v850_v3 }
0x1116   :  { %v924_v5 = vpop.f32.mrf.mxu0 }
0x1117   :  { %v928_v6 = vadd.f32 %v924_v5, %v1612_v59 }
0x1118   :  { %v1269_v9 = vpop.f32.mrf.mxu0 }
0x1119   :  { %1341 = vtanh.f32 %v928_v6  ;;  %v1124_v11 = vmul.f32 -1.442695, %v928_v6 }
0x111b   :  { %1343 = vpow2.f32 %v1124_v11 }
0x1126   :  { %v1342_v10 = vpop.eup %1341 }
0x1127   :  { %938 = vrot.lane.b32.xlu1 %v1342_v10, %s1472_s0 }
0x1128   :  { %v1344_v12 = vpop.eup %1343 }
0x1129   :  { %v932_v13 = vadd.f32 1.0, %v1344_v12 }
0x112b   :  { %1345 = vrcp.f32 %v932_v13 }
0x1138   :  { %v1346_v14 = vpop.eup %1345 }
0x1139   :  { %v936_v17 = vmul.f32 %v1346_v14, %v841_v62 }
0x1199   :  { %v939_v15 = vpop.permute.xlu1 %938 }
0x119a   :  { %v941_v16 = vmul.f32 %v1346_v14, %v939_v15 }
0x119c   :  { %943 = vrot.lane.b32.xlu0 %v941_v16, %s1473_s2 }
0x120e   :  { %v944_v18 = vpop.permute.xlu0 %943 }
0x120f   :  { %v946_v19 = vadd.f32 %v944_v18, %v936_v17 }
0x1211   :  { %1347 = vtanh.f32 %v946_v19 }
0x121e   :  { %v1348_v59 = vpop.eup %1347 }
0x121f   :  { %949 = vrot.lane.b32.xlu1 %v1348_v59, %s1472_s0 }
0x1291   :  { %v950_v20 = vpop.permute.xlu1 %949 }
0x1292   :  { %v952_v21 = vmul.f32 %v1346_v14, %v950_v20 }
0x1294   :  { %954 = vrot.lane.b32.xlu0 %v952_v21, %s1473_s2 }
0x1306   :  { %v955_v22 = vpop.permute.xlu0 %954 }
0x1307   :  { %958 = vst.msk [vmem:[#allocation11 + $0x30] sm:$0xff] %vm63_vm0, %v955_v22  ;;  %1279 = vmatmul.mubr.msk.f32.vlgmr.msra.gmra.mxu1 %vm63_vm0, %v955_v22 }
0x13c7   :  { %v1029_v23 = vpop.f32.mrf.mxu1 }
0x13c8   :  { %v1033_v24 = vadd.f32 %v1610_v58, %v1029_v23 }
0x13c9   :  { %v1280_v25 = vpop.f32.mrf.mxu1 }
0x13ca   :  { %1349 = vtanh.f32 %v1033_v24  ;;  %v1126_v27 = vmul.f32 -1.442695, %v1033_v24 }
0x13cc   :  { %1351 = vpow2.f32 %v1126_v27 }
0x13d7   :  { %v1350_v26 = vpop.eup %1349 }
0x13d8   :  { %1043 = vrot.lane.b32.xlu1 %v1350_v26, %s1472_s0 }
0x13d9   :  { %v1352_v28 = vpop.eup %1351 }
0x13da   :  { %v1037_v29 = vadd.f32 1.0, %v1352_v28 }
0x13dc   :  { %1353 = vrcp.f32 %v1037_v29 }
0x13e9   :  { %v1354_v30 = vpop.eup %1353 }
0x13ea   :  { %v1041_v33 = vmul.f32 %v1354_v30, %v946_v19 }
0x144a   :  { %v1044_v31 = vpop.permute.xlu1 %1043 }
0x144b   :  { %v1046_v32 = vmul.f32 %v1354_v30, %v1044_v31 }
0x144d   :  { %1048 = vrot.lane.b32.xlu0 %v1046_v32, %s1473_s2 }
0x14bf   :  { %v1049_v34 = vpop.permute.xlu0 %1048 }
0x14c0   :  { %v1051_v35 = vadd.f32 %v1049_v34, %v1041_v33 }
0x14c2   :  { %1355 = vtanh.f32 %v1051_v35 }
0x14cf   :  { %v1356_v58 = vpop.eup %1355 }
0x14d0   :  { %1054 = vrot.lane.b32.xlu1 %v1356_v58, %s1472_s0 }
0x14d4   :  { %1066 = vrot.lane.b32.xlu1 %v1051_v35, %s1474_s5 }
0x1542   :  { %v1055_v36 = vpop.permute.xlu1 %1054 }
0x1543   :  { %v1057_v37 = vmul.f32 %v1354_v30, %v1055_v36 }
0x1545   :  { %1059 = vrot.lane.b32.xlu0 %v1057_v37, %s1473_s2 }
0x1546   :  { %v1067_v38 = vpop.permute.xlu1 %1066 }
0x1547   :  { %1069 = vst.msk [vmem:[#allocation3] sm:$0xff] %vm63_vm0, %v1067_v38 }
0x15b7   :  { %v1060_v39 = vpop.permute.xlu0 %1059 }
0x15b8   :  { %1063 = vst.msk [vmem:[#allocation11 + $0x38] sm:$0xff] %vm63_vm0, %v1060_v39  ;;  %1064 = vst.msk [vmem:[#allocation2] sm:$0xff] %vm63_vm0, %v1060_v39 }
0x15b9   :  { %1070 = vst.msk [vmem:[#allocation12] sm:$0xff] %vm63_vm0, %v1060_v39 }
0x15ba   :  { %1428 = shalt.err (!%p1425_p5)
}
0x15bb   :  { %1082 = dma.vmem_to_hbm [thread:$0]  %s1077_s7, 1024, %s1696_s3, [#allocation7], %s1467_s20, %s1467_s20, %s1468_s21  }
0x15bc   :  { %s1437_s13 = scalar_lea.vmem %s1090_s9, 128  ;;  %p1442_p7 = scmp.lt.s32.totalorder %s1090_s9, %s1090_s9 }
0x15bd   :  { %p1438_p6 = scmp.ne.s32.totalorder %s1090_s9, %s1437_s13  ;;  %p1443_p8 = scmp.lt.s32.totalorder %s1437_s13, %s1437_s13 }
0x15bf   :  { %p1444_p9 = por %p1443_p8, %p1442_p7 }
0x15c1   :  { %p1445_p10 = pnand %p1444_p9, %p1438_p6 }
0x15c3   :  { %1448 = shalt.err (!%p1445_p10)
}
0x15c4   :  { %1092 = dma.vmem_to_hbm [thread:$0]  %s1090_s9, 128, %s1697_s4, [#allocation13]  }
0x15c5   :  { %1461 = dma.done.wait [#allocation7], 1024  }
0x15c6   :  { %1462 = vsyncadd [#allocation7], 4294966272 }
0x15c7   :  { %1463 = dma.done.wait [#allocation13], 128  }
0x15c8   :  { %1464 = vsyncadd [#allocation13], 4294967168 }
0x15c9   :  { %1099 = vsyncpa [#allocation6], 1 }
0x15ca   :  { %1100 = vsyncpa [#allocation9], 1 }
0x15cb   :  { %1101 = vsyncpa [#allocation7], 1 }
0x15cc   :  { %1102 = vsyncpa [#allocation13], 1 }

</bundles_post_ra>
